<compile_context>
chip_gen: v6e
topology: v6e:2x2x1
jax: 0.10.0
libtpu: 0.0.40
codegen_flags: <defaults>
</compile_context>

<pallas_src>
import math

import jax
import jax.numpy as jnp
from jax.experimental import pallas as pl
from jax.experimental.pallas import tpu as pltpu  # noqa: F401  (TPU backend / params)

# ---- model dims (small, VMEM-resident) ----
B = 2        # batch
S_ENC = 8    # encoder sequence length
T_DEC = 8    # decoder sequence length (== ys length)
H = 32       # hidden size
V = 128      # vocab size (lane-friendly)

PADDING_IDX = 0
START_IDX = 1
END_IDX = 2
UNKNOWN_IDX = 3

_NEG = -1e9
_INV_SQRT_H = 1.0 / math.sqrt(H)


def _fused_decoder_output_kernel(dec_ids_ref, emb_ref, enc_ref, addmask_ref,
                                 wdec_ref, bdec_ref, wout_ref, bout_ref,
                                 logits_ref):
    """Fused decoder + output head over the folded batch (single invocation).

    dec_ids_ref: (B*T, 1)   int32  shifted decoder token ids
    emb_ref    : (V, H)     bf16   embedding table (VMEM resident)
    enc_ref    : (B*S, H)   bf16   encoder outputs, batch-folded
    addmask_ref: (B*T, B*S) f32    block-diag additive mask (0 valid, -1e9 else)
    wdec_ref   : (H, H) bf16, bdec_ref: (1, H) f32
    wout_ref   : (H, V) bf16, bout_ref: (1, V) f32
    logits_ref : (B*T, V)   f32
    """
    n_dec = dec_ids_ref.shape[0]
    vocab = emb_ref.shape[0]

    emb = emb_ref[...]                                   # (V, H)   bf16
    enc = enc_ref[...]                                   # (B*S, H) bf16

    # --- decoder-input embedding gather as a one-hot MXU matmul ---
    ids = dec_ids_ref[...]                               # (B*T, 1) int32
    iota_v = jax.lax.broadcasted_iota(jnp.int32, (n_dec, vocab), 1)
    onehot = jnp.where(ids == iota_v, 1.0, 0.0).astype(emb.dtype)     # (B*T, V) bf16
    dec = jnp.dot(onehot, emb,
                  preferred_element_type=jnp.float32).astype(emb.dtype)  # (B*T, H) bf16

    # --- cross attention: single 2D QK^T / PV matmuls over the folded batch ---
    scores = jnp.einsum('qd,kd->qk', dec, enc,
                        preferred_element_type=jnp.float32)           # (B*T, B*S) f32
    scores = scores * _INV_SQRT_H + addmask_ref[...]     # mask before row-max

    m = jnp.max(scores, axis=-1, keepdims=True)
    p = jnp.exp(scores - m)                              # cross-batch -> exactly 0
    denom = jnp.sum(p, axis=-1, keepdims=True)
    attn = p * pl.reciprocal(denom, approx=True)         # EUP slot

    ctx = jnp.dot(attn.astype(enc.dtype), enc,
                  preferred_element_type=jnp.float32)    # (B*T, H) f32

    # --- decoder projection (latent); residual in bf16 ---
    x = dec + ctx.astype(dec.dtype)                      # (B*T, H) bf16
    latent = jnp.tanh(
        jnp.dot(x, wdec_ref[...], preferred_element_type=jnp.float32)
        + bdec_ref[...])                                 # (B*T, H) f32

    # --- output head: bias folded in, single lane-dense f32 store ---
    logits = jnp.dot(latent.astype(wout_ref.dtype), wout_ref[...],
                     preferred_element_type=jnp.float32) + bout_ref[...]
    logits_ref[...] = logits                             # (B*T, V) f32


def _decode_pallas(dec_ids, emb, enc2d, add_mask, w_dec, b_dec, w_out, b_out):
    """Single grid-less Pallas invocation over the whole (folded) batch."""
    n_dec = dec_ids.shape[0]
    n_enc = enc2d.shape[0]
    # TODO(synk): at real ParlAI sizes (V~50K, H~1024) tile the output head over
    # V (grid axis, W_out spec (H, tn), tn a multiple of 128, ~half the tile on
    # v7x's 64 MiB VMEM) and add a "parallel" row-tile axis via
    # pltpu.CompilerParams(dimension_semantics=...) so v7x's 2 TensorCores are
    # used; at B*T=16 rows a grid would be pure overhead.
    return pl.pallas_call(
        _fused_decoder_output_kernel,
        out_shape=jax.ShapeDtypeStruct((n_dec, V), jnp.float32),
        in_specs=[
            pl.BlockSpec((n_dec, 1), lambda: (0, 0)),        # dec token ids (int32)
            pl.BlockSpec((V, H), lambda: (0, 0)),            # embedding (bf16)
            pl.BlockSpec((n_enc, H), lambda: (0, 0)),        # enc_out folded (bf16)
            pl.BlockSpec((n_dec, n_enc), lambda: (0, 0)),    # additive mask (f32)
            pl.BlockSpec((H, H), lambda: (0, 0)),            # W_dec (bf16)
            pl.BlockSpec((1, H), lambda: (0, 0)),            # b_dec (f32)
            pl.BlockSpec((H, V), lambda: (0, 0)),            # W_out (bf16)
            pl.BlockSpec((1, V), lambda: (0, 0)),            # b_out (f32)
        ],
        out_specs=pl.BlockSpec((n_dec, V), lambda: (0, 0)),
    )(dec_ids, emb, enc2d, add_mask, w_dec, b_dec, w_out, b_out)


def init_params(key):
    """Deterministic synthetic parameters. bf16 copies cached at init (no
    per-call casts inside the jitted forward)."""
    k_emb, k_wdec, k_wout = jax.random.split(key, 3)
    scale = 0.02
    # TODO(synk): for training you would keep f32 master weights alongside.
    return {
        "embedding": (scale * jax.random.normal(k_emb, (V, H), jnp.float32)
                      ).astype(jnp.bfloat16),
        "w_dec": (scale * jax.random.normal(k_wdec, (H, H), jnp.float32)
                  ).astype(jnp.bfloat16),
        "b_dec": jnp.zeros((1, H), jnp.float32),
        "w_out": (scale * jax.random.normal(k_wout, (H, V), jnp.float32)
                  ).astype(jnp.bfloat16),
        "b_out": jnp.zeros((1, V), jnp.float32),
        "START": jnp.array([START_IDX], jnp.int32),  # register_buffer('START', ...)
    }


def encoder(params, xs):
    """encoder(xs) -> (enc_out, enc_hidden, attn_mask).

    Stays in XLA: enc_out must be materialized anyway since it is returned as
    part of encoder_states (prev_enc reuse), so fusing this gather saves no HBM
    traffic."""
    enc_out = jnp.take(params["embedding"], xs, axis=0)   # (B, S, H) bf16
    attn_mask = (xs != PADDING_IDX)                        # (B, S) bool
    return enc_out, None, attn_mask


def decode_forced(params, encoder_states, ys):
    """Mirror of TorchGeneratorModel.decode_forced."""
    enc_out, _, attn_mask = encoder_states
    bsz, seqlen = ys.shape

    # inputs = cat([START, ys[:, :-1]], dim=1)
    inputs = ys[:, : seqlen - 1]
    start = jnp.broadcast_to(params["START"], (bsz, 1)).astype(ys.dtype)
    inputs = jnp.concatenate([start, inputs], axis=1)              # (B, T)
    dec_ids = inputs.reshape(bsz * seqlen, 1).astype(jnp.int32)    # (B*T, 1)

    # Block-diagonal additive mask over the folded batch:
    # 0 where same batch AND encoder token is non-pad, -1e9 otherwise.
    s_enc = attn_mask.shape[1]
    batch_q = jnp.repeat(jnp.arange(bsz, dtype=jnp.int32), seqlen)   # (B*T,)
    batch_k = jnp.repeat(jnp.arange(bsz, dtype=jnp.int32), s_enc)    # (B*S,)
    same_batch = batch_q[:, None] == batch_k[None, :]
    valid_k = attn_mask.reshape(bsz * s_enc)
    add_mask = jnp.where(same_batch & valid_k[None, :], 0.0, _NEG
                         ).astype(jnp.float32)                      # (B*T, B*S)

    enc2d = enc_out.reshape(bsz * s_enc, H)                         # (B*S, H) bf16

    logits2d = _decode_pallas(dec_ids, params["embedding"], enc2d, add_mask,
                              params["w_dec"], params["b_dec"],
                              params["w_out"], params["b_out"])     # (B*T, V) f32
    logits = logits2d.reshape(bsz, seqlen, V)                       # free leading-dim view

    # argmax over dim=2 in XLA: scores are returned to HBM anyway; keeping the
    # kernel store lane-dense avoids a masked last-dim-1 store.
    preds = jnp.argmax(logits, axis=-1).astype(jnp.int32)           # (B, T)
    return logits, preds


def forward(params, xs, ys, prev_enc=None):
    """TorchGeneratorModel.forward: (scores, preds, encoder_states)."""
    assert ys is not None, "Greedy decoding in TGModel.forward no longer supported."
    # TODO(synk): longest_label bookkeeping (mutable Python state) omitted — no
    # effect on the forward outputs.
    encoder_states = prev_enc if prev_enc is not None else encoder(params, xs)
    scores, preds = decode_forced(params, encoder_states, ys)
    return scores, preds, encoder_states


if __name__ == "__main__":
    key = jax.random.PRNGKey(0)
    k_params, k_xs, k_ys = jax.random.split(key, 3)

    params = init_params(k_params)

    # Token ids in [UNKNOWN_IDX+1, V); pad last two encoder positions to
    # exercise the attention mask.
    xs = jax.random.randint(k_xs, (B, S_ENC), UNKNOWN_IDX + 1, V, dtype=jnp.int32)
    xs = xs.at[:, -2:].set(PADDING_IDX)
    ys = jax.random.randint(k_ys, (B, T_DEC), UNKNOWN_IDX + 1, V, dtype=jnp.int32)
    ys = ys.at[:, -1].set(END_IDX)

    scores, preds, enc_states = jax.jit(forward)(params, xs, ys)
    jax.block_until_ready((scores, preds))

    assert scores.shape == (B, T_DEC, V) and scores.dtype == jnp.float32
    assert preds.shape == (B, T_DEC) and preds.dtype == jnp.int32
    print("KERNEL_OK")
</pallas_src>

<mosaic_0001>
module attributes {stable_mosaic.version = 11 : i64} {
  func.func @_fused_decoder_output_kernel(%arg0: memref<16x1xi32, #tpu.memory_space<vmem>>, %arg1: memref<128x32xbf16, #tpu.memory_space<vmem>>, %arg2: memref<16x32xbf16, #tpu.memory_space<vmem>>, %arg3: memref<16x16xf32, #tpu.memory_space<vmem>>, %arg4: memref<32x32xbf16, #tpu.memory_space<vmem>>, %arg5: memref<1x32xf32, #tpu.memory_space<vmem>>, %arg6: memref<32x128xbf16, #tpu.memory_space<vmem>>, %arg7: memref<1x128xf32, #tpu.memory_space<vmem>>, %arg8: memref<16x128xf32, #tpu.memory_space<vmem>>) attributes {dimension_semantics = [], scalar_prefetch = 0 : i64, scratch_operands = 0 : i64, tpu.core_type = #tpu.core_type<tc>} {
    %c0 = arith.constant 0 : index
    %c0_0 = arith.constant 0 : index
    %0 = vector.load %arg1[%c0, %c0_0] : memref<128x32xbf16, #tpu.memory_space<vmem>>, vector<128x32xbf16>
    %c0_1 = arith.constant 0 : index
    %c0_2 = arith.constant 0 : index
    %1 = vector.load %arg2[%c0_1, %c0_2] : memref<16x32xbf16, #tpu.memory_space<vmem>>, vector<16x32xbf16>
    %c0_3 = arith.constant 0 : index
    %c0_4 = arith.constant 0 : index
    %2 = vector.load %arg0[%c0_3, %c0_4] : memref<16x1xi32, #tpu.memory_space<vmem>>, vector<16x1xi32>
    %3 = tpu.iota {dimensions = array<i32: 1>} : vector<16x128xi32>
    %4 = vector.broadcast %2 : vector<16x1xi32> to vector<16x128xi32>
    %5 = arith.cmpi eq, %4, %3 : vector<16x128xi32>
    %cst = arith.constant 1.000000e+00 : f32
    %cst_5 = arith.constant 0.000000e+00 : f32
    %6 = vector.broadcast %cst : f32 to vector<16x128xf32>
    %7 = vector.broadcast %cst_5 : f32 to vector<16x128xf32>
    %8 = arith.select %5, %6, %7 : vector<16x128xi1>, vector<16x128xf32>
    %9 = arith.truncf %8 : vector<16x128xf32> to vector<16x128xbf16>
    %cst_6 = arith.constant dense<0.000000e+00> : vector<16x32xf32>
    %10 = tpu.matmul %9, %0, %cst_6 {dimension_numbers = #tpu.dot_dimension_numbers<[1], [0], [0], [1], [0, 0, 1, 1], [], []>} : vector<16x128xbf16>, vector<128x32xbf16>, vector<16x32xf32> -> vector<16x32xf32>
    %11 = arith.truncf %10 : vector<16x32xf32> to vector<16x32xbf16>
    "tpu.trace_start"() <{level = 10 : i32, message = "qd,kd->qk"}> : () -> ()
    %cst_7 = arith.constant dense<0.000000e+00> : vector<16x16xf32>
    %12 = tpu.matmul %11, %1, %cst_7 {dimension_numbers = #tpu.dot_dimension_numbers<[1], [1], [0], [0], [0, 0, 1, 0], [], []>} : vector<16x32xbf16>, vector<16x32xbf16>, vector<16x16xf32> -> vector<16x16xf32>
    "tpu.trace_stop"() : () -> ()
    %cst_8 = arith.constant 0.176776692 : f32
    %13 = vector.broadcast %cst_8 : f32 to vector<16x16xf32>
    %14 = arith.mulf %12, %13 : vector<16x16xf32>
    %c0_9 = arith.constant 0 : index
    %c0_10 = arith.constant 0 : index
    %15 = vector.load %arg3[%c0_9, %c0_10] : memref<16x16xf32, #tpu.memory_space<vmem>>, vector<16x16xf32>
    %16 = arith.addf %14, %15 : vector<16x16xf32>
    %cst_11 = arith.constant dense<0xFF800000> : vector<16xf32>
    %17 = vector.multi_reduction <maximumf>, %16, %cst_11 [1] : vector<16x16xf32> to vector<16xf32>
    %18 = vector.shape_cast %17 : vector<16xf32> to vector<16x1xf32>
    %19 = vector.broadcast %18 : vector<16x1xf32> to vector<16x16xf32>
    %20 = arith.subf %16, %19 : vector<16x16xf32>
    %21 = math.exp %20 : vector<16x16xf32>
    %cst_12 = arith.constant dense<0.000000e+00> : vector<16xf32>
    %22 = vector.multi_reduction <add>, %21, %cst_12 [1] : vector<16x16xf32> to vector<16xf32>
    %23 = vector.shape_cast %22 : vector<16xf32> to vector<16x1xf32>
    %24 = tpu.reciprocal %23 {approx = true} : vector<16x1xf32> -> vector<16x1xf32>
    %25 = vector.broadcast %24 : vector<16x1xf32> to vector<16x16xf32>
    %26 = arith.mulf %21, %25 : vector<16x16xf32>
    %27 = arith.truncf %26 : vector<16x16xf32> to vector<16x16xbf16>
    %cst_13 = arith.constant dense<0.000000e+00> : vector<16x32xf32>
    %28 = tpu.matmul %27, %1, %cst_13 {dimension_numbers = #tpu.dot_dimension_numbers<[1], [0], [0], [1], [0, 0, 1, 1], [], []>} : vector<16x16xbf16>, vector<16x32xbf16>, vector<16x32xf32> -> vector<16x32xf32>
    %29 = arith.truncf %28 : vector<16x32xf32> to vector<16x32xbf16>
    %30 = arith.addf %11, %29 : vector<16x32xbf16>
    %c0_14 = arith.constant 0 : index
    %c0_15 = arith.constant 0 : index
    %31 = vector.load %arg4[%c0_14, %c0_15] : memref<32x32xbf16, #tpu.memory_space<vmem>>, vector<32x32xbf16>
    %cst_16 = arith.constant dense<0.000000e+00> : vector<16x32xf32>
    %32 = tpu.matmul %30, %31, %cst_16 {dimension_numbers = #tpu.dot_dimension_numbers<[1], [0], [0], [1], [0, 0, 1, 1], [], []>} : vector<16x32xbf16>, vector<32x32xbf16>, vector<16x32xf32> -> vector<16x32xf32>
    %c0_17 = arith.constant 0 : index
    %c0_18 = arith.constant 0 : index
    %33 = vector.load %arg5[%c0_17, %c0_18] : memref<1x32xf32, #tpu.memory_space<vmem>>, vector<1x32xf32>
    %34 = vector.broadcast %33 : vector<1x32xf32> to vector<16x32xf32>
    %35 = arith.addf %32, %34 : vector<16x32xf32>
    %36 = math.tanh %35 : vector<16x32xf32>
    %37 = arith.truncf %36 : vector<16x32xf32> to vector<16x32xbf16>
    %c0_19 = arith.constant 0 : index
    %c0_20 = arith.constant 0 : index
    %38 = vector.load %arg6[%c0_19, %c0_20] : memref<32x128xbf16, #tpu.memory_space<vmem>>, vector<32x128xbf16>
    %cst_21 = arith.constant dense<0.000000e+00> : vector<16x128xf32>
    %39 = tpu.matmul %37, %38, %cst_21 {dimension_numbers = #tpu.dot_dimension_numbers<[1], [0], [0], [1], [0, 0, 1, 1], [], []>} : vector<16x32xbf16>, vector<32x128xbf16>, vector<16x128xf32> -> vector<16x128xf32>
    %c0_22 = arith.constant 0 : index
    %c0_23 = arith.constant 0 : index
    %40 = vector.load %arg7[%c0_22, %c0_23] : memref<1x128xf32, #tpu.memory_space<vmem>>, vector<1x128xf32>
    %41 = vector.broadcast %40 : vector<1x128xf32> to vector<16x128xf32>
    %42 = arith.addf %39, %41 : vector<16x128xf32>
    %c0_24 = arith.constant 0 : index
    %c0_25 = arith.constant 0 : index
    %43 = vector.load %arg8[%c0_24, %c0_25] : memref<16x128xf32, #tpu.memory_space<vmem>>, vector<16x128xf32>
    tpu.vector_store %arg8[%c0_24, %c0_25], %42 {strides = array<i32>} : memref<16x128xf32, #tpu.memory_space<vmem>>, vector<16x128xf32>,
    return
  }
}

</mosaic_0001>

<bundles_post_ra>
// kernel: forward.1
= control target key start
LH: loop header
LB: loop body
LE: loop exit
PB: predicated region body
PF: predicated region fallthrough
CT: control target
= control target key end

     0   :  { %v544_v0 = vmov 0   ;;  %v545_v2 = vmov 0.0   ;;  %vm546_vm0 = vmmov 0   ;;  %v50_v12 = vlaneseq  ;;  %s689_s0 = inlined_call_operand.vmem [shape: s32[16,1], index: 0, kind: input, shape index: {}]   ;;  %s690_s1 = inlined_call_operand.vmem [shape: bf16[128,32], index: 1, kind: input, shape index: {}]   ;;  %s691_s2 = inlined_call_operand.vmem [shape: bf16[16,32], index: 2, kind: input, shape index: {}]   ;;  %s692_s3 = inlined_call_operand.vmem [shape: f32[16,16], index: 3, kind: input, shape index: {}]   ;;  %s693_s4 = inlined_call_operand.vmem [shape: bf16[32,32], index: 4, kind: input, shape index: {}]   ;;  %s694_s6 = inlined_call_operand.vmem [shape: bf16[32,128], index: 6, kind: input, shape index: {}]   ;;  %s695_s5 = inlined_call_operand.vmem [shape: f32[1,32], index: 5, kind: input, shape index: {}]   ;;  %s696_s7 = inlined_call_operand.vmem [shape: f32[1,128], index: 7, kind: input, shape index: {}]   ;;  %s697_s8 = inlined_call_operand.vmem [shape: f32[16,128], index: 8, kind: output, shape index: {}]  }
   0x1   :  { %518 = vset.pattern.permute.xlu0 %v544_v0  ;;  %v48_v1 = vld [vmem:[%s689_s0] sm:$0xff]  ;;  %466 = vmatprep.subr.bf16.mxu0 %v545_v2  ;;  %v519_v3 = vld [vmem:[%s690_s1 + $0x38] sm:$0xff]   ;;  %v49_v4 = vld [vmem:[%s689_s0 + $0x8] sm:$0xff]  ;;  %v547_v16 = vmov 1.0|1.0   ;;  %vm158_vm4 = vcmask 261120  }
   0x2   :  { %53 = vperm.xlu0 %518, %v48_v1   ;;  %486 = vmatprep.subr.bf16.mxu1 %v545_v2  ;;  %v520_v5 = vld [vmem:[%s690_s1 + $0x30] sm:$0xff]   ;;  %v521_v6 = vld [vmem:[%s690_s1 + $0x28] sm:$0xff]   ;;  %v522_v7 = vld [vmem:[%s690_s1 + $0x20] sm:$0xff]   ;;  %v51_v14 = vand.u32 127, %v50_v12  ;;  %vm212_vm5 = vcmask 130048  }
   0x3   :  { %467 = vmatpush3.bf16.msra.mxu0 %v519_v3  ;;  %482 = vmatprep.mubr.msk.bf16.mxu0 %vm546_vm0, %v545_v2  ;;  %v523_v8 = vld [vmem:[%s690_s1 + $0x18] sm:$0xff]   ;;  %v524_v9 = vld [vmem:[%s690_s1 + $0x10] sm:$0xff]   ;;  %v525_v10 = vld [vmem:[%s690_s1 + $0x8] sm:$0xff]  }
   0x4   :  { %468 = vmatprep.subr.bf16.mxu0 %v545_v2  ;;  %488 = vmatprep.mubr.msk.bf16.mxu1 %vm546_vm0, %v545_v2  ;;  %v526_v11 = vld [vmem:[%s690_s1] sm:$0xff]   ;;  %v209_v30 = vld [vmem:[%s692_s3 + $0x8] sm:$0xff] }
   0x5   :  { %v527_v17 = vld [vmem:[%s691_s2] sm:$0xff]   ;;  %v528_v53 = vld [vmem:[%s693_s4 + $0x8] sm:$0xff]  }
   0x6   :  { %56 = vperm.xlu0 %518, %v49_v4   ;;  %v163_v18 = vsel %vm158_vm4, %v527_v17, 0  ;;  %v208_v25 = vld [vmem:[%s692_s3] sm:$0xff]  ;;  %v530_v61 = vld [vmem:[%s694_s6 + $0x8] sm:$0xff]  }
   0x7   :  { %469 = vmatpush3.bf16.msra.mxu0 %v520_v5  ;;  %487 = vmatpush3.bf16.xpose.msra.mxu1 %v163_v18  ;;  %v529_v54 = vld [vmem:[%s693_s4] sm:$0xff]  }
   0x8   :  { %470 = vmatprep.subr.bf16.mxu0 %v545_v2  ;;  %492 = vmatprep.subr.bf16.mxu1 %v545_v2  ;;  %v531_v62 = vld [vmem:[%s694_s6] sm:$0xff]  }
   0x9   :  { %v439_v63 = vld [vmem:[%s695_s5] ss:$0 sm:$0xff] }
   0xb   :  { %471 = vmatpush3.bf16.msra.mxu0 %v521_v6 }
   0xc   :  { %472 = vmatprep.subr.bf16.mxu0 %v545_v2 }
   0xf   :  { %473 = vmatpush3.bf16.msra.mxu0 %v522_v7 }
  0x10   :  { %474 = vmatprep.subr.bf16.mxu0 %v545_v2 }
  0x13   :  { %475 = vmatpush3.bf16.msra.mxu0 %v523_v8 }
  0x14   :  { %476 = vmatprep.subr.bf16.mxu0 %v545_v2 }
  0x17   :  { %477 = vmatpush3.bf16.msra.mxu0 %v524_v9 }
  0x18   :  { %478 = vmatprep.subr.bf16.mxu0 %v545_v2 }
  0x1b   :  { %479 = vmatpush3.bf16.msra.mxu0 %v525_v10 }
  0x1c   :  { %480 = vmatprep.subr.bf16.mxu0 %v545_v2 }
  0x1f   :  { %481 = vmatpush3.bf16.msra.mxu0 %v526_v11 }
  0x7d   :  { %v54_v13 = vpop.permute.xlu0 %53 }
  0x7e   :  { %vm58_vm1 = vcmp.eq.s32.totalorder %v54_v13, %v51_v14 }
  0x81   :  { %v57_v15 = vpop.permute.xlu0 %56 }
  0x82   :  { %vm59_vm2 = vcmp.eq.s32.totalorder %v57_v15, %v51_v14 }
  0x83   :  { %vm434_vm3 = vmpackc.low %vm59_vm2, %vm58_vm1 }
  0x84   :  { %483 = vmatmul.mubr.msk.bf16.vlgmr.msra.gmra.mxu0 %vm434_vm3, %v547_v16 }
 0x144   :  { %v145_v19 = vpop.f32.mrf.mxu0 }
 0x146   :  { %v484_v20 = vpop.f32.mrf.mxu0 }
 0x148   :  { %v148_v21 = vpop.f32.mrf.mxu0 }
 0x149   :  { %v152_v22 = vpack.c.bf16 %v148_v21, %v145_v19 }
 0x14a   :  { %v485_v23 = vpop.f32.mrf.mxu0 }
 0x14b   :  { %489 = vmatmul.mubr.msk.bf16.vlgmr.msra.gmra.mxu1 %vm158_vm4, %v152_v22 }
 0x14c   :  { %493 = vmatpush3.bf16.msra.mxu1 %v527_v17  ;;  %494 = vmatprep.mubr.msk.bf16.mxu1 %vm546_vm0, %v545_v2 }
 0x14d   :  { %498 = vmatprep.subr.bf16.mxu1 %v545_v2 }
 0x20b   :  { %v199_v24 = vpop.f32.mrf.mxu1 }
 0x20c   :  { %v206_v26 = vmul.f32 0.17677669, %v199_v24 }
 0x20d   :  { %v490_v27 = vpop.f32.mrf.mxu1 }
 0x20e   :  { %v210_v28 = vadd.f32 %v208_v25, %v206_v26 }
 0x20f   :  { %v202_v29 = vpop.f32.mrf.mxu1 }
 0x210   :  { %v207_v31 = vmul.f32 0.17677669, %v202_v29  ;;  %v213_v32 = vsel %vm212_vm5, %v210_v28, -inf }
 0x211   :  { %214 = vmax.xlane.f32.xlu1 %v213_v32  ;;  %v491_v33 = vpop.f32.mrf.mxu1 }
 0x212   :  { %v211_v34 = vadd.f32 %v209_v30, %v207_v31 }
 0x214   :  { %v216_v35 = vsel %vm212_vm5, %v211_v34, -inf }
 0x215   :  { %217 = vmax.xlane.f32.xlu1 %v216_v35 }
 0x29a   :  { %v215_v36 = vpop.xlane.xlu1 %214 }
 0x29b   :  { %v219_v37 = vsub.f32 %v210_v28, %v215_v36 }
 0x29d   :  { %v221_v38 = vmul.f32 1.442695, %v219_v37 }
 0x29e   :  { %v218_v39 = vpop.xlane.xlu1 %217 }
 0x29f   :  { %532 = vpow2.f32 %v221_v38  ;;  %v220_v40 = vsub.f32 %v211_v34, %v218_v39 }
 0x2a1   :  { %v223_v41 = vmul.f32 1.442695, %v220_v40 }
 0x2a3   :  { %534 = vpow2.f32 %v223_v41 }
 0x2ac   :  { %v533_v42 = vpop.eup %532 }
 0x2ad   :  { %v225_v43 = vsel %vm212_vm5, %v533_v42, 0.0 }
 0x2ae   :  { %226 = vadd.xlane.f32.xlu0 %v225_v43 }
 0x2b0   :  { %v535_v44 = vpop.eup %534 }
 0x2b1   :  { %v228_v45 = vsel %vm212_vm5, %v535_v44, 0.0 }
 0x2b2   :  { %229 = vadd.xlane.f32.xlu1 %v228_v45 }
 0x337   :  { %v227_v46 = vpop.xlane.xlu0 %226 }
 0x338   :  { %536 = vrcp.f32 %v227_v46 }
 0x33b   :  { %v230_v47 = vpop.xlane.xlu1 %229 }
 0x33c   :  { %538 = vrcp.f32 %v230_v47 }
 0x345   :  { %v537_v48 = vpop.eup %536 }
 0x346   :  { %v233_v50 = vmul.f32 %v537_v48, %v533_v42 }
 0x349   :  { %v539_v49 = vpop.eup %538 }
 0x34a   :  { %v234_v51 = vmul.f32 %v539_v49, %v535_v44 }
 0x34c   :  { %v235_v52 = vpack.c.bf16 %v234_v51, %v233_v50 }
 0x34e   :  { %495 = vmatmul.mubr.msk.bf16.vlgmr.msra.gmra.mxu1 %vm212_vm5, %v235_v52 }
 0x34f   :  { %502 = vmatprep.mubr.msk.bf16.mxu1 %vm546_vm0, %v545_v2  ;;  %499 = vmatpush3.bf16.msra.mxu1 %v528_v53 }
 0x350   :  { %500 = vmatprep.subr.bf16.mxu1 %v545_v2 }
 0x353   :  { %501 = vmatpush3.bf16.msra.mxu1 %v529_v54 }
 0x354   :  { %506 = vmatprep.subr.bf16.mxu1 %v545_v2 }
 0x40e   :  { %v274_v55 = vpop.f32.mrf.mxu1 }
 0x410   :  { %v496_v56 = vpop.f32.mrf.mxu1 }
 0x412   :  { %v277_v57 = vpop.f32.mrf.mxu1 }
 0x413   :  { %v281_v58 = vpack.c.bf16 %v277_v57, %v274_v55 }
 0x414   :  { %v497_v59 = vpop.f32.mrf.mxu1 }
 0x415   :  { %v282_v60 = vadd.bf16 %v281_v58, %v152_v22 }
 0x417   :  { %503 = vmatmul.mubr.msk.bf16.vlgmr.msra.gmra.mxu1 %vm158_vm4, %v282_v60 }
 0x418   :  { %510 = vmatprep.mubr.msk.bf16.mxu1 %vm546_vm0, %v545_v2  ;;  %507 = vmatpush3.bf16.msra.mxu1 %v530_v61 }
 0x419   :  { %508 = vmatprep.subr.bf16.mxu1 %v545_v2  ;;  %v443_v2 = vld [vmem:[%s696_s7] ss:$0 sm:$0xff] }
 0x41c   :  { %509 = vmatpush3.bf16.msra.mxu1 %v531_v62 }
 0x4d7   :  { %v343_v0 = vpop.f32.mrf.mxu1 }
 0x4d8   :  { %v344_v1 = vadd.f32 %v439_v63, %v343_v0 }
 0x4d9   :  { %v504_v3 = vpop.f32.mrf.mxu1 }
 0x4da   :  { %540 = vtanh.f32 %v344_v1 }
 0x4db   :  { %v346_v4 = vpop.f32.mrf.mxu1 }
 0x4dc   :  { %v347_v5 = vadd.f32 %v439_v63, %v346_v4 }
 0x4dd   :  { %v505_v6 = vpop.f32.mrf.mxu1 }
 0x4de   :  { %542 = vtanh.f32 %v347_v5 }
 0x4e7   :  { %v541_v7 = vpop.eup %540 }
 0x4eb   :  { %v543_v8 = vpop.eup %542 }
 0x4ec   :  { %v352_v9 = vpack.c.bf16 %v543_v8, %v541_v7 }
 0x4ee   :  { %511 = vmatmul.mubr.msk.bf16.vlgmr.msra.gmra.mxu1 %vm158_vm4, %v352_v9 }
 0x5ae   :  { %v413_v10 = vpop.f32.mrf.mxu1 }
 0x5af   :  { %v414_v11 = vadd.f32 %v443_v2, %v413_v10 }
 0x5b0   :  { %v512_v12 = vpop.f32.mrf.mxu1 }
 0x5b1   :  { %420 = vst [vmem:[%s697_s8] sm:$0xff] %v414_v11 }
 0x5b2   :  { %v416_v13 = vpop.f32.mrf.mxu1 }
 0x5b3   :  { %v417_v14 = vadd.f32 %v443_v2, %v416_v13 }
 0x5b4   :  { %v513_v15 = vpop.f32.mrf.mxu1 }
 0x5b5   :  { %421 = vst [vmem:[%s697_s8 + $0x8] sm:$0xff] %v417_v14 }

</bundles_post_ra>
